<compile_context>
chip_gen: v7x
topology: tpu7x:2x2x1
jax: 0.10.0
libtpu: 0.0.40
codegen_flags: <defaults>
</compile_context>

<pallas_src>
import functools

import jax
import jax.numpy as jnp
from jax.experimental import pallas as pl
from jax.experimental.pallas import tpu as pltpu

DIM_X = 1
DIM_Y = 1
DIM_HID = 128
DIM_IN = DIM_X + DIM_Y + 1  # yenc + wenc


def _neuboots_kernel(x_ref, w1_ref, b_ref, wpre_ref, wpost_ref, out_ref, *,
                     mxu_dtype):
    # One grid step == BT batch elements.
    bt, n, _ = x_ref.shape
    h_dim = out_ref.shape[-1]

    x = x_ref[...]                                        # (BT, N, DIM_IN) f32
    # Bootstrap weights are the last column of the concatenated input.
    wgt = x[:, :, DIM_X + DIM_Y:DIM_X + DIM_Y + 1]        # (BT, N, 1)

    w1 = w1_ref[...]                                      # (DIM_IN, H) f32
    b = b_ref[...]                                        # (6, H) f32 (hoisted bias reads)

    # ---- layer 1 (K=3): three VPU broadcast FMAs, keeps the MXU free.
    h = (x[:, :, 0:1] * w1[0:1, :]
         + x[:, :, 1:2] * w1[1:2, :]
         + wgt * w1[2:3, :]
         + b[0:1, :])                                     # (BT, N, H) f32
    h = jnp.maximum(h, 0.0)

    # ---- layers 2..3: dense (BT*N, H) @ (H, H) bf16 MXU matmuls, f32 accumulate.
    h = h.reshape(bt * n, h_dim)
    h = jnp.maximum(
        jnp.dot(h.astype(mxu_dtype), wpre_ref[0],
                preferred_element_type=jnp.float32) + b[1:2, :], 0.0)
    h = jnp.maximum(
        jnp.dot(h.astype(mxu_dtype), wpre_ref[1],
                preferred_element_type=jnp.float32) + b[2:3, :], 0.0)

    # ---- aggregation hoisted above the linear 4th pre-layer:
    #   mean_n((h3 @ W4 + b4) * w) == sum_n(w*h3) @ (W4/N) + (sum_n(w)/N) * b4
    # W4/N is wpost_ref[0], b4/N is b[3:4,:] (scaled in the wrapper).  Padded
    # set rows have w == 0, so they contribute nothing to either sum.
    h3 = h.reshape(bt, n, h_dim)
    hsum = jnp.sum(h3 * wgt, axis=1)                      # (BT, H)
    wsum = jnp.sum(wgt, axis=1)                           # (BT, 1)
    agg = (jnp.dot(hsum.astype(mxu_dtype), wpost_ref[0],
                   preferred_element_type=jnp.float32)
           + wsum * b[3:4, :])                            # (BT, H)

    # ---- net_post on the full (BT, H) block.
    p = jnp.maximum(
        jnp.dot(agg.astype(mxu_dtype), wpost_ref[1],
                preferred_element_type=jnp.float32) + b[4:5, :], 0.0)
    p = jnp.dot(p.astype(mxu_dtype), wpost_ref[2],
                preferred_element_type=jnp.float32) + b[5:6, :]

    out_ref[...] = p.astype(out_ref.dtype)


def neuboots_encoder(xc, yc, w, params, *, block_rows=2048,
                     mxu_dtype=jnp.bfloat16):
    """xc: [B,N,dim_x], yc: [B,N,dim_y], w: [B,N,1]  ->  [B, DIM_HID]."""
    B, N, _ = xc.shape
    # Glue: concatenation of encoder inputs (yenc=True, wenc=True).
    x = jnp.concatenate([xc, yc, w], axis=-1).astype(jnp.float32)  # (B, N, DIM_IN)

    # Pad the set axis to a multiple of 8 (sublane) so the in-kernel reshape
    # (BT, N, H) <-> (BT*N, H) is layout-preserving.  Padded rows have w == 0.
    n_pad = ((N + 7) // 8) * 8
    if n_pad != N:
        x = jnp.pad(x, ((0, 0), (0, n_pad - N), (0, 0)))

    # --- Batch tile: target ~block_rows (b, n) rows feeding the MXU per step
    #     (amortizes ~0.35 us per-step overhead and MXU pipeline fill).
    bt = max(1, block_rows // n_pad)
    if bt >= B:
        bt = B                              # single step covers the whole batch
    else:
        bt = max(8, (bt // 8) * 8)          # keep (BT, H) output block sublane-dense
    num_steps = pl.cdiv(B, bt)
    if num_steps == 1 and B > 16:
        # Dual-TC chips (v7x): keep >= 2 parallel grid steps so both cores work.
        bt = max(8, (((B + 1) // 2) + 7) // 8 * 8)
        num_steps = pl.cdiv(B, bt)
    b_pad = num_steps * bt
    if b_pad != B:
        x = jnp.pad(x, ((0, b_pad - B), (0, 0), (0, 0)))

    # --- Pack weights. MXU-facing weights in mxu_dtype; 1/N folded into layer 4.
    (w1, b1), (w2, b2), (w3, b3), (w4, b4), (wp1, bp1), (wp2, bp2) = params
    inv_n = 1.0 / N
    w1p = w1.astype(jnp.float32)                                         # (3, H)
    biases = jnp.concatenate(
        [b1, b2, b3, b4 * inv_n, bp1, bp2], axis=0).astype(jnp.float32)  # (6, H)
    wpre = jnp.stack([w2, w3], axis=0).astype(mxu_dtype)                 # (2, H, H)
    wpost = jnp.stack([w4 * inv_n, wp1, wp2], axis=0).astype(mxu_dtype)  # (3, H, H)

    kernel = functools.partial(_neuboots_kernel, mxu_dtype=mxu_dtype)

    # Advisory cost estimate for XLA's scheduler around the custom call.
    w_itemsize = jnp.dtype(mxu_dtype).itemsize
    flops = int(2 * b_pad * n_pad * DIM_HID * (DIM_IN + 2 * DIM_HID)   # layers 1-3
                + 2 * 3 * b_pad * DIM_HID * DIM_HID)                    # layer 4 + post
    bytes_accessed = int(b_pad * n_pad * DIM_IN * 4 + b_pad * DIM_HID * 4
                         + 5 * DIM_HID * DIM_HID * w_itemsize
                         + (DIM_IN + 6) * DIM_HID * 4)

    out = pl.pallas_call(
        kernel,
        out_shape=jax.ShapeDtypeStruct((b_pad, DIM_HID), jnp.float32),
        grid_spec=pltpu.PrefetchScalarGridSpec(
            num_scalar_prefetch=0,
            grid=(num_steps,),
            in_specs=[
                pl.BlockSpec((bt, n_pad, DIM_IN), lambda b: (b, 0, 0)),
                pl.BlockSpec(w1p.shape, lambda b: (0, 0)),
                pl.BlockSpec(biases.shape, lambda b: (0, 0)),
                pl.BlockSpec(wpre.shape, lambda b: (0, 0, 0)),
                pl.BlockSpec(wpost.shape, lambda b: (0, 0, 0)),
            ],
            out_specs=pl.BlockSpec((bt, DIM_HID), lambda b: (b, 0)),
        ),
        compiler_params=pltpu.CompilerParams(
            dimension_semantics=("parallel",),
            vmem_limit_bytes=48 * 1024 * 1024),
        cost_estimate=pl.CostEstimate(
            flops=flops, transcendentals=0, bytes_accessed=bytes_accessed),
    )(x, w1p, biases, wpre, wpost)
    return out[:B]


def init_params(key):
    """Deterministic synthetic weights with the module's shapes.
       Linear weights stored as (in, out); biases as (1, out)."""
    keys = jax.random.split(key, 12)

    def lin(kw, kb, din, dout):
        scale = 1.0 / jnp.sqrt(din)
        W = jax.random.uniform(kw, (din, dout), jnp.float32, -scale, scale)
        b = jax.random.uniform(kb, (1, dout), jnp.float32, -scale, scale)
        return W, b

    p = []
    # net_pre (pre_depth=4): 3->128, 128->128, 128->128, 128->128
    p.append(lin(keys[0], keys[1], DIM_IN, DIM_HID))
    p.append(lin(keys[2], keys[3], DIM_HID, DIM_HID))
    p.append(lin(keys[4], keys[5], DIM_HID, DIM_HID))
    p.append(lin(keys[6], keys[7], DIM_HID, DIM_HID))
    # net_post (post_depth=2): 128->128, 128->128
    p.append(lin(keys[8], keys[9], DIM_HID, DIM_HID))
    p.append(lin(keys[10], keys[11], DIM_HID, DIM_HID))
    return p


def reference(xc, yc, w, params):
    x = jnp.concatenate([xc, yc, w], axis=-1)
    (w1, b1), (w2, b2), (w3, b3), (w4, b4), (wp1, bp1), (wp2, bp2) = params
    h = jax.nn.relu(x @ w1 + b1)
    h = jax.nn.relu(h @ w2 + b2)
    h = jax.nn.relu(h @ w3 + b3)
    h = h @ w4 + b4
    agg = jnp.mean(h * w, axis=-2)
    p = jax.nn.relu(agg @ wp1 + bp1)
    return p @ wp2 + bp2


if __name__ == "__main__":
    key = jax.random.PRNGKey(0)
    kx, ky, kw, kp = jax.random.split(key, 4)

    B, N = 2, 8
    xc = jax.random.normal(kx, (B, N, DIM_X), jnp.float32)
    yc = jax.random.normal(ky, (B, N, DIM_Y), jnp.float32)
    w = jax.random.uniform(kw, (B, N, 1), jnp.float32)

    params = init_params(kp)
    ref = reference(xc, yc, w, params)

    # f32-MXU path: tight check against the pure-JAX reference.
    out_f32 = jax.block_until_ready(
        neuboots_encoder(xc, yc, w, params, mxu_dtype=jnp.float32))
    assert out_f32.shape == (B, DIM_HID)
    assert jnp.allclose(out_f32, ref, atol=1e-4, rtol=1e-4)

    # bf16-MXU path (default fast path): loose check, bf16 operand rounding.
    out_bf16 = jax.block_until_ready(neuboots_encoder(xc, yc, w, params))
    assert out_bf16.shape == (B, DIM_HID)
    rel_err = jnp.max(jnp.abs(out_bf16 - ref)) / (jnp.max(jnp.abs(ref)) + 1e-6)
    assert rel_err < 5e-2, rel_err

    print("KERNEL_OK")
</pallas_src>

<mosaic_0001>
module attributes {stable_mosaic.version = 11 : i64} {
  func.func @_neuboots_kernel(%arg0: i32, %arg1: memref<2x8x3xf32, #tpu.memory_space<vmem>>, %arg2: memref<3x128xf32, #tpu.memory_space<vmem>>, %arg3: memref<6x128xf32, #tpu.memory_space<vmem>>, %arg4: memref<2x128x128xf32, #tpu.memory_space<vmem>>, %arg5: memref<3x128x128xf32, #tpu.memory_space<vmem>>, %arg6: memref<2x128xf32, #tpu.memory_space<vmem>>) attributes {dimension_semantics = [#tpu.dimension_semantics<parallel>], iteration_bounds = array<i64: 1>, scalar_prefetch = 0 : i64, scratch_operands = 0 : i64, tpu.core_type = #tpu.core_type<tc>, window_params = [{transform_indices = @transform_0, window_bounds = array<i64: 2, 8, 3>}, {pipeline_mode = #tpu.pipeline_mode<synchronous>, transform_indices = @transform_1, window_bounds = array<i64: 3, 128>}, {pipeline_mode = #tpu.pipeline_mode<synchronous>, transform_indices = @transform_2, window_bounds = array<i64: 6, 128>}, {pipeline_mode = #tpu.pipeline_mode<synchronous>, transform_indices = @transform_3, window_bounds = array<i64: 2, 128, 128>}, {pipeline_mode = #tpu.pipeline_mode<synchronous>, transform_indices = @transform_4, window_bounds = array<i64: 3, 128, 128>}, {transform_indices = @transform_5, window_bounds = array<i64: 2, 128>}]} {
    %c0 = arith.constant 0 : index
    %c0_0 = arith.constant 0 : index
    %c0_1 = arith.constant 0 : index
    %0 = vector.load %arg1[%c0, %c0_0, %c0_1] : memref<2x8x3xf32, #tpu.memory_space<vmem>>, vector<2x8x3xf32>
    %1 = vector.extract_strided_slice %0 {offsets = [0, 0, 2], sizes = [2, 8, 1], strides = [1, 1, 1]} : vector<2x8x3xf32> to vector<2x8x1xf32>
    %c0_2 = arith.constant 0 : index
    %c0_3 = arith.constant 0 : index
    %2 = vector.load %arg2[%c0_2, %c0_3] : memref<3x128xf32, #tpu.memory_space<vmem>>, vector<3x128xf32>
    %c0_4 = arith.constant 0 : index
    %c0_5 = arith.constant 0 : index
    %3 = vector.load %arg3[%c0_4, %c0_5] : memref<6x128xf32, #tpu.memory_space<vmem>>, vector<6x128xf32>
    %4 = vector.extract_strided_slice %0 {offsets = [0, 0, 0], sizes = [2, 8, 1], strides = [1, 1, 1]} : vector<2x8x3xf32> to vector<2x8x1xf32>
    %5 = vector.extract_strided_slice %2 {offsets = [0, 0], sizes = [1, 128], strides = [1, 1]} : vector<3x128xf32> to vector<1x128xf32>
    %6 = vector.shape_cast %5 : vector<1x128xf32> to vector<1x1x128xf32>
    %7 = vector.broadcast %4 : vector<2x8x1xf32> to vector<2x8x128xf32>
    %8 = vector.broadcast %6 : vector<1x1x128xf32> to vector<2x8x128xf32>
    %9 = arith.mulf %7, %8 : vector<2x8x128xf32>
    %10 = vector.extract_strided_slice %0 {offsets = [0, 0, 1], sizes = [2, 8, 1], strides = [1, 1, 1]} : vector<2x8x3xf32> to vector<2x8x1xf32>
    %11 = vector.extract_strided_slice %2 {offsets = [1, 0], sizes = [1, 128], strides = [1, 1]} : vector<3x128xf32> to vector<1x128xf32>
    %12 = vector.shape_cast %11 : vector<1x128xf32> to vector<1x1x128xf32>
    %13 = vector.broadcast %10 : vector<2x8x1xf32> to vector<2x8x128xf32>
    %14 = vector.broadcast %12 : vector<1x1x128xf32> to vector<2x8x128xf32>
    %15 = arith.mulf %13, %14 : vector<2x8x128xf32>
    %16 = arith.addf %9, %15 : vector<2x8x128xf32>
    %17 = vector.extract_strided_slice %2 {offsets = [2, 0], sizes = [1, 128], strides = [1, 1]} : vector<3x128xf32> to vector<1x128xf32>
    %18 = vector.shape_cast %17 : vector<1x128xf32> to vector<1x1x128xf32>
    %19 = vector.broadcast %1 : vector<2x8x1xf32> to vector<2x8x128xf32>
    %20 = vector.broadcast %18 : vector<1x1x128xf32> to vector<2x8x128xf32>
    %21 = arith.mulf %19, %20 : vector<2x8x128xf32>
    %22 = arith.addf %16, %21 : vector<2x8x128xf32>
    %23 = vector.extract_strided_slice %3 {offsets = [0, 0], sizes = [1, 128], strides = [1, 1]} : vector<6x128xf32> to vector<1x128xf32>
    %24 = vector.shape_cast %23 : vector<1x128xf32> to vector<1x1x128xf32>
    %25 = vector.broadcast %24 : vector<1x1x128xf32> to vector<2x8x128xf32>
    %26 = arith.addf %22, %25 : vector<2x8x128xf32>
    %cst = arith.constant 0.000000e+00 : f32
    %27 = vector.broadcast %cst : f32 to vector<2x8x128xf32>
    %28 = arith.maximumf %26, %27 : vector<2x8x128xf32>
    %29 = vector.shape_cast %28 : vector<2x8x128xf32> to vector<16x128xf32>
    %c0_6 = arith.constant 0 : index
    %c0_7 = arith.constant 0 : index
    %c0_8 = arith.constant 0 : index
    %30 = vector.load %arg4[%c0_6, %c0_7, %c0_8] : memref<2x128x128xf32, #tpu.memory_space<vmem>>, vector<1x128x128xf32>
    %31 = vector.shape_cast %30 : vector<1x128x128xf32> to vector<128x128xf32>
    %cst_9 = arith.constant dense<0.000000e+00> : vector<16x128xf32>
    %32 = tpu.matmul %29, %31, %cst_9 {dimension_numbers = #tpu.dot_dimension_numbers<[1], [0], [0], [1], [0, 0, 1, 1], [], []>} : vector<16x128xf32>, vector<128x128xf32>, vector<16x128xf32> -> vector<16x128xf32>
    %33 = vector.extract_strided_slice %3 {offsets = [1, 0], sizes = [1, 128], strides = [1, 1]} : vector<6x128xf32> to vector<1x128xf32>
    %34 = vector.broadcast %33 : vector<1x128xf32> to vector<16x128xf32>
    %35 = arith.addf %32, %34 : vector<16x128xf32>
    %cst_10 = arith.constant 0.000000e+00 : f32
    %36 = vector.broadcast %cst_10 : f32 to vector<16x128xf32>
    %37 = arith.maximumf %35, %36 : vector<16x128xf32>
    %c1 = arith.constant 1 : index
    %c0_11 = arith.constant 0 : index
    %c0_12 = arith.constant 0 : index
    %38 = vector.load %arg4[%c1, %c0_11, %c0_12] : memref<2x128x128xf32, #tpu.memory_space<vmem>>, vector<1x128x128xf32>
    %39 = vector.shape_cast %38 : vector<1x128x128xf32> to vector<128x128xf32>
    %cst_13 = arith.constant dense<0.000000e+00> : vector<16x128xf32>
    %40 = tpu.matmul %37, %39, %cst_13 {dimension_numbers = #tpu.dot_dimension_numbers<[1], [0], [0], [1], [0, 0, 1, 1], [], []>} : vector<16x128xf32>, vector<128x128xf32>, vector<16x128xf32> -> vector<16x128xf32>
    %41 = vector.extract_strided_slice %3 {offsets = [2, 0], sizes = [1, 128], strides = [1, 1]} : vector<6x128xf32> to vector<1x128xf32>
    %42 = vector.broadcast %41 : vector<1x128xf32> to vector<16x128xf32>
    %43 = arith.addf %40, %42 : vector<16x128xf32>
    %cst_14 = arith.constant 0.000000e+00 : f32
    %44 = vector.broadcast %cst_14 : f32 to vector<16x128xf32>
    %45 = arith.maximumf %43, %44 : vector<16x128xf32>
    %46 = vector.shape_cast %45 : vector<16x128xf32> to vector<2x8x128xf32>
    %47 = vector.broadcast %1 : vector<2x8x1xf32> to vector<2x8x128xf32>
    %48 = arith.mulf %46, %47 : vector<2x8x128xf32>
    %cst_15 = arith.constant dense<0.000000e+00> : vector<2x128xf32>
    %49 = vector.multi_reduction <add>, %48, %cst_15 [1] : vector<2x8x128xf32> to vector<2x128xf32>
    %cst_16 = arith.constant dense<0.000000e+00> : vector<2x1xf32>
    %50 = vector.multi_reduction <add>, %1, %cst_16 [1] : vector<2x8x1xf32> to vector<2x1xf32>
    %c0_17 = arith.constant 0 : index
    %c0_18 = arith.constant 0 : index
    %c0_19 = arith.constant 0 : index
    %51 = vector.load %arg5[%c0_17, %c0_18, %c0_19] : memref<3x128x128xf32, #tpu.memory_space<vmem>>, vector<1x128x128xf32>
    %52 = vector.shape_cast %51 : vector<1x128x128xf32> to vector<128x128xf32>
    %cst_20 = arith.constant dense<0.000000e+00> : vector<2x128xf32>
    %53 = tpu.matmul %49, %52, %cst_20 {dimension_numbers = #tpu.dot_dimension_numbers<[1], [0], [0], [1], [0, 0, 1, 1], [], []>} : vector<2x128xf32>, vector<128x128xf32>, vector<2x128xf32> -> vector<2x128xf32>
    %54 = vector.extract_strided_slice %3 {offsets = [3, 0], sizes = [1, 128], strides = [1, 1]} : vector<6x128xf32> to vector<1x128xf32>
    %55 = vector.broadcast %50 : vector<2x1xf32> to vector<2x128xf32>
    %56 = vector.broadcast %54 : vector<1x128xf32> to vector<2x128xf32>
    %57 = arith.mulf %55, %56 : vector<2x128xf32>
    %58 = arith.addf %53, %57 : vector<2x128xf32>
    %c1_21 = arith.constant 1 : index
    %c0_22 = arith.constant 0 : index
    %c0_23 = arith.constant 0 : index
    %59 = vector.load %arg5[%c1_21, %c0_22, %c0_23] : memref<3x128x128xf32, #tpu.memory_space<vmem>>, vector<1x128x128xf32>
    %60 = vector.shape_cast %59 : vector<1x128x128xf32> to vector<128x128xf32>
    %cst_24 = arith.constant dense<0.000000e+00> : vector<2x128xf32>
    %61 = tpu.matmul %58, %60, %cst_24 {dimension_numbers = #tpu.dot_dimension_numbers<[1], [0], [0], [1], [0, 0, 1, 1], [], []>} : vector<2x128xf32>, vector<128x128xf32>, vector<2x128xf32> -> vector<2x128xf32>
    %62 = vector.extract_strided_slice %3 {offsets = [4, 0], sizes = [1, 128], strides = [1, 1]} : vector<6x128xf32> to vector<1x128xf32>
    %63 = vector.broadcast %62 : vector<1x128xf32> to vector<2x128xf32>
    %64 = arith.addf %61, %63 : vector<2x128xf32>
    %cst_25 = arith.constant 0.000000e+00 : f32
    %65 = vector.broadcast %cst_25 : f32 to vector<2x128xf32>
    %66 = arith.maximumf %64, %65 : vector<2x128xf32>
    %c2 = arith.constant 2 : index
    %c0_26 = arith.constant 0 : index
    %c0_27 = arith.constant 0 : index
    %67 = vector.load %arg5[%c2, %c0_26, %c0_27] : memref<3x128x128xf32, #tpu.memory_space<vmem>>, vector<1x128x128xf32>
    %68 = vector.shape_cast %67 : vector<1x128x128xf32> to vector<128x128xf32>
    %cst_28 = arith.constant dense<0.000000e+00> : vector<2x128xf32>
    %69 = tpu.matmul %66, %68, %cst_28 {dimension_numbers = #tpu.dot_dimension_numbers<[1], [0], [0], [1], [0, 0, 1, 1], [], []>} : vector<2x128xf32>, vector<128x128xf32>, vector<2x128xf32> -> vector<2x128xf32>
    %70 = vector.extract_strided_slice %3 {offsets = [5, 0], sizes = [1, 128], strides = [1, 1]} : vector<6x128xf32> to vector<1x128xf32>
    %71 = vector.broadcast %70 : vector<1x128xf32> to vector<2x128xf32>
    %72 = arith.addf %69, %71 : vector<2x128xf32>
    %c0_29 = arith.constant 0 : index
    %c0_30 = arith.constant 0 : index
    %73 = vector.load %arg6[%c0_29, %c0_30] : memref<2x128xf32, #tpu.memory_space<vmem>>, vector<2x128xf32>
    tpu.vector_store %arg6[%c0_29, %c0_30], %72 {strides = array<i32>} : memref<2x128xf32, #tpu.memory_space<vmem>>, vector<2x128xf32>,
    return
  }
  func.func @transform_0(%arg0: i32) -> (i32, i32, i32) {
    %c0_i32 = arith.constant 0 : i32
    %c0_i32_0 = arith.constant 0 : i32
    %c0_i32_1 = arith.constant 0 : i32
    return %arg0, %c0_i32, %c0_i32_0 : i32, i32, i32
  }
  func.func @transform_1(%arg0: i32) -> (i32, i32) {
    %c0_i32 = arith.constant 0 : i32
    %c0_i32_0 = arith.constant 0 : i32
    %c0_i32_1 = arith.constant 0 : i32
    return %c0_i32, %c0_i32_0 : i32, i32
  }
  func.func @transform_2(%arg0: i32) -> (i32, i32) {
    %c0_i32 = arith.constant 0 : i32
    %c0_i32_0 = arith.constant 0 : i32
    %c0_i32_1 = arith.constant 0 : i32
    return %c0_i32, %c0_i32_0 : i32, i32
  }
  func.func @transform_3(%arg0: i32) -> (i32, i32, i32) {
    %c0_i32 = arith.constant 0 : i32
    %c0_i32_0 = arith.constant 0 : i32
    %c0_i32_1 = arith.constant 0 : i32
    %c0_i32_2 = arith.constant 0 : i32
    return %c0_i32, %c0_i32_0, %c0_i32_1 : i32, i32, i32
  }
  func.func @transform_4(%arg0: i32) -> (i32, i32, i32) {
    %c0_i32 = arith.constant 0 : i32
    %c0_i32_0 = arith.constant 0 : i32
    %c0_i32_1 = arith.constant 0 : i32
    %c0_i32_2 = arith.constant 0 : i32
    return %c0_i32, %c0_i32_0, %c0_i32_1 : i32, i32, i32
  }
  func.func @transform_5(%arg0: i32) -> (i32, i32) {
    %c0_i32 = arith.constant 0 : i32
    %c0_i32_0 = arith.constant 0 : i32
    return %arg0, %c0_i32 : i32, i32
  }
}

</mosaic_0001>

<bundles_post_ra>
// kernel: tpu_custom_call.1
= control target key start
LH: loop header
LB: loop body
LE: loop exit
PB: predicated region body
PF: predicated region fallthrough
CT: control target
= control target key end

     0   :  { %10 = vsyncpa [#allocation3], 0  ;;  %s1281_s0 = inlined_call_operand.vmem [shape: f32[2,8,3], index: 0, kind: input, shape index: {}]   ;;  %s1282_s1 = inlined_call_operand.vmem [shape: f32[3,128], index: 1, kind: input, shape index: {}]   ;;  %s1283_s2 = inlined_call_operand.vmem [shape: f32[6,128], index: 2, kind: input, shape index: {}]   ;;  %s1284_s3 = inlined_call_operand.hbm [shape: f32[2,128,128], index: 3, kind: input, shape index: {}]   ;;  %s1285_s4 = inlined_call_operand.hbm [shape: f32[3,128,128], index: 4, kind: input, shape index: {}]   ;;  %s1286_s5 = inlined_call_operand.hbm [shape: f32[2,128], index: 5, kind: output, shape index: {}]  }
   0x1   :  { %11 = vsyncpa [#allocation6], 0 }
   0x2   :  { %12 = vsyncpa [#allocation4], 0  ;;  %s1132_s18 = smov [#allocation2]   ;;  %s1060_s22 = scalar_lea.hbm %s1284_s3, 4096 }
   0x3   :  { %s24_s19 = sshll.u32 %s1132_s18, 4  ;;  %p1061_p0 = scmp.ne.s32.totalorder %s1284_s3, %s1060_s22  ;;  %s25_s19 = int_to_ptr.vmem [resolvable:$true] %s24_s19 }
   0x4   :  { %p1064_p1 = scmp.lt.u32.totalorder %s1060_s22, %s1284_s3 }
   0x6   :  { %p1066_p2 = pnand %p1064_p1, %p1061_p0 }
   0x8   :  { %1069 = shalt.err (!%p1066_p2)
}
   0x9   :  { %s1070_s27 = scalar_lea.vmem %s25_s19, 4096  ;;  %p1075_p4 = scmp.lt.s32.totalorder %s25_s19, %s25_s19 }
   0xa   :  { %p1071_p3 = scmp.ne.s32.totalorder %s25_s19, %s1070_s27  ;;  %p1076_p5 = scmp.lt.s32.totalorder %s1070_s27, %s1070_s27 }
   0xc   :  { %p1077_p6 = por %p1076_p5, %p1075_p4 }
   0xe   :  { %p1078_p7 = pnand %p1077_p6, %p1071_p3 }
  0x10   :  { %1081 = shalt.err (!%p1078_p7)
}
  0x11   :  { %s1133_s28 = smov 128   ;;  %s1134_s29 = smov 8  }
  0x12   :  { %30 = dma.hbm_to_vmem [thread:$0]  %s1284_s3, 4096, %s25_s19, [#allocation3], %s1133_s28, %s1133_s28, %s1134_s29  }
  0x13   :  { %s1135_s7 = smov [#allocation5]   ;;  %s1082_s11 = scalar_lea.hbm %s1285_s4, 6144 }
  0x14   :  { %s36_s8 = sshll.u32 %s1135_s7, 4  ;;  %p1083_p8 = scmp.ne.s32.totalorder %s1285_s4, %s1082_s11  ;;  %s37_s8 = int_to_ptr.vmem [resolvable:$true] %s36_s8 }
  0x15   :  { %p1086_p9 = scmp.lt.u32.totalorder %s1082_s11, %s1285_s4 }
  0x17   :  { %p1088_p10 = pnand %p1086_p9, %p1083_p8 }
  0x19   :  { %1091 = shalt.err (!%p1088_p10)
}
  0x1a   :  { %s1092_s16 = scalar_lea.vmem %s37_s8, 6144  ;;  %p1097_p12 = scmp.lt.s32.totalorder %s37_s8, %s37_s8 }
  0x1b   :  { %p1093_p11 = scmp.ne.s32.totalorder %s37_s8, %s1092_s16  ;;  %p1098_p13 = scmp.lt.s32.totalorder %s1092_s16, %s1092_s16 }
  0x1d   :  { %p1099_p0 = por %p1098_p13, %p1097_p12 }
  0x1f   :  { %p1100_p1 = pnand %p1099_p0, %p1093_p11 }
  0x21   :  { %1103 = shalt.err (!%p1100_p1)
}
  0x22   :  { %42 = dma.hbm_to_vmem [thread:$0]  %s1285_s4, 6144, %s37_s8, [#allocation6], %s1133_s28, %s1133_s28, %s1134_s29  }
  0x23   :  { %1126 = dma.done.wait [#allocation3], 4096  }
  0x24   :  { %1127 = vsyncadd [#allocation3], 4294963200 }
  0x25   :  { %1128 = dma.done.wait [#allocation6], 6144  }
  0x26   :  { %1129 = vsyncadd [#allocation6], 4294961152  ;;  %v1136_v0 = vmov 0   ;;  %vm318_vm0 = vcmask 23568   ;;  %v50_v1 = vld [vmem:[%s1281_s0 + $0x8] sm:$0xff]  ;;  %v49_v2 = vld [vmem:[%s1281_s0] sm:$0xff] }
  0x27   :  { %1056 = vset.pattern.permute.xlu1 %v1136_v0  ;;  %1054 = vset.pattern.permute.xlu0 %v1136_v0  ;;  %v109_v3 = vld [vmem:[#allocation2] sm:$0xff]  ;;  %v326_v4 = vsel %vm318_vm0, %v50_v1, 0.0  ;;  %v319_v5 = vsel %vm318_vm0, %v49_v2, 0.0  ;;  %v110_v6 = vld [vmem:[#allocation2 + $0x8] sm:$0xff]  ;;  %v111_v7 = vld [vmem:[#allocation2 + $0x10] sm:$0xff]  ;;  %v1137_v15 = vmov 1   ;;  %v63_v0 = vlaneseq }
  0x28   :  { %60 = vperm.xlu1 %1056, %v50_v1   ;;  %55 = vperm.xlu0 %1054, %v49_v2   ;;  %v112_v8 = vld [vmem:[#allocation2 + $0x18] sm:$0xff]  ;;  %v327_v9 = vrot.slane %v326_v4, 4  ;;  %v320_v10 = vrot.slane %v319_v5, 4  ;;  %v907_v11 = vpack.c.bf16 %v110_v6, %v109_v3  ;;  %v113_v18 = vld [vmem:[#allocation2 + $0x20] sm:$0xff]  ;;  %v114_v19 = vld [vmem:[#allocation2 + $0x28] sm:$0xff]  ;;  %v1138_v23 = vmov 2  }
  0x29   :  { %v911_v14 = vpack.c.bf16 %v112_v8, %v111_v7  ;;  %v915_v22 = vpack.c.bf16 %v114_v19, %v113_v18  ;;  %v115_v25 = vld [vmem:[#allocation2 + $0x30] sm:$0xff]  ;;  %v116_v26 = vld [vmem:[#allocation2 + $0x38] sm:$0xff]  ;;  %v117_v30 = vld [vmem:[#allocation2 + $0x40] sm:$0xff]  ;;  %vm1140_vm1 = vmmov 0   ;;  %vm367_vm2 = vcmask 1041409  }
  0x2a   :  { %v328_v12 = vadd.f32 %v327_v9, %v326_v4  ;;  %v321_v13 = vadd.f32 %v320_v10, %v319_v5  ;;  %908 = vmatprep.subr.bf16.mxu0 %v907_v11  ;;  %v919_v29 = vpack.c.bf16 %v116_v26, %v115_v25  ;;  %v118_v31 = vld [vmem:[#allocation2 + $0x48] sm:$0xff]  ;;  %v119_v34 = vld [vmem:[#allocation2 + $0x50] sm:$0xff]  ;;  %v120_v35 = vld [vmem:[#allocation2 + $0x58] sm:$0xff] }
  0x2b   :  { %910 = vmatpush3.bf16.msra.mxu0 %v907_v11  ;;  %v923_v33 = vpack.c.bf16 %v118_v31, %v117_v30  ;;  %v207_v36 = vld [vmem:[#allocation2 + $0x80] sm:$0xff]  ;;  %v208_v37 = vld [vmem:[#allocation2 + $0x88] sm:$0xff]  ;;  %v209_v38 = vld [vmem:[#allocation2 + $0x90] sm:$0xff]  ;;  %v927_v39 = vpack.c.bf16 %v120_v35, %v119_v34 }
  0x2c   :  { %1057 = vset.pattern.permute.xlu1 %v1137_v15  ;;  %1055 = vset.pattern.permute.xlu0 %v1137_v15  ;;  %v329_v16 = vrot.slane %v328_v12, 2  ;;  %v322_v17 = vrot.slane %v321_v13, 2  ;;  %v121_v40 = vld [vmem:[#allocation2 + $0x60] sm:$0xff]  ;;  %v939_v41 = vpack.c.bf16 %v208_v37, %v207_v36  ;;  %v210_v42 = vld [vmem:[#allocation2 + $0x98] sm:$0xff]  ;;  %v122_v43 = vld [vmem:[#allocation2 + $0x68] sm:$0xff]  ;;  %v1139_v37 = vmov 0.0|0.0  }
  0x2d   :  { %74 = vperm.xlu1 %1057, %v50_v1   ;;  %70 = vperm.xlu0 %1055, %v49_v2   ;;  %v943_v44 = vpack.c.bf16 %v210_v42, %v209_v38  ;;  %v211_v45 = vld [vmem:[#allocation2 + $0xa0] sm:$0xff]  ;;  %v212_v46 = vld [vmem:[#allocation2 + $0xa8] sm:$0xff]  ;;  %v931_v47 = vpack.c.bf16 %v122_v43, %v121_v40  ;;  %v123_v48 = vld [vmem:[#allocation2 + $0x70] sm:$0xff] }
  0x2e   :  { %v330_v20 = vadd.f32 %v329_v16, %v328_v12  ;;  %v323_v21 = vadd.f32 %v322_v17, %v321_v13  ;;  %912 = vmatprep.subr.bf16.mxu0 %v911_v14  ;;  %940 = vmatprep.subr.bf16.mxu1 %v939_v41  ;;  %v947_v49 = vpack.c.bf16 %v212_v46, %v211_v45  ;;  %v124_v50 = vld [vmem:[#allocation2 + $0x78] sm:$0xff]  ;;  %v213_v51 = vld [vmem:[#allocation2 + $0xb0] sm:$0xff]  ;;  %v215_v55 = vld [vmem:[#allocation2 + $0xc0] sm:$0xff] }
  0x2f   :  { %914 = vmatpush3.bf16.msra.mxu0 %v911_v14  ;;  %942 = vmatpush3.bf16.msra.mxu1 %v939_v41  ;;  %v214_v52 = vld [vmem:[#allocation2 + $0xb8] sm:$0xff]  ;;  %v935_v53 = vpack.c.bf16 %v124_v50, %v123_v48  ;;  %v216_v56 = vld [vmem:[#allocation2 + $0xc8] sm:$0xff]  ;;  %v217_v58 = vld [vmem:[#allocation2 + $0xd0] sm:$0xff] }
  0x30   :  { %v331_v24 = vrot.slane %v330_v20, 1  ;;  %v324_v27 = vrot.slane %v323_v21, 1  ;;  %916 = vmatprep.subr.bf16.mxu0 %v915_v22  ;;  %944 = vmatprep.subr.bf16.mxu1 %v943_v44  ;;  %v951_v54 = vpack.c.bf16 %v214_v52, %v213_v51  ;;  %v955_v57 = vpack.c.bf16 %v216_v56, %v215_v55  ;;  %v218_v59 = vld [vmem:[#allocation2 + $0xd8] sm:$0xff]  ;;  %v219_v61 = vld [vmem:[#allocation2 + $0xe0] sm:$0xff]  ;;  %v220_v62 = vld [vmem:[#allocation2 + $0xe8] sm:$0xff] }
  0x31   :  { %1058 = vset.pattern.permute.xlu1 %v1138_v23  ;;  %1059 = vset.pattern.permute.xlu0 %v1138_v23  ;;  %v959_v60 = vpack.c.bf16 %v218_v59, %v217_v58  ;;  %v963_v63 = vpack.c.bf16 %v220_v62, %v219_v61  ;;  %v51_v6 = vld [vmem:[%s1282_s1] sm:$0x7]  ;;  %v221_v31 = vld [vmem:[#allocation2 + $0xf0] sm:$0xff]  ;;  %v334_v35 = vld [vmem:[#allocation5 + $0x8] sm:$0xff]  ;;  %s1142_s1 = smov [#allocation7]  }
  0x32   :  { %86 = vperm.xlu1 %1058, %v49_v2   ;;  %90 = vperm.xlu0 %1059, %v50_v1   ;;  %v332_v28 = vadd.f32 %v331_v24, %v330_v20  ;;  %v325_v32 = vadd.f32 %v324_v27, %v323_v21  ;;  %v1203_v1 = vshrl.u32 %v63_v0, 7  ;;  %v1216_v15 = vld [vmem:[%s1283_s2] sm:$0x3f]  ;;  %v335_v36 = vld [vmem:[#allocation5 + $0x10] sm:$0xff]  ;;  %v338_v42 = vld [vmem:[#allocation5 + $0x28] sm:$0xff]  ;;  %s635_s2 = sshll.u32 %s1142_s1, 4  ;;  %s636_s2 = int_to_ptr.vmem [resolvable:$true] %s635_s2 }
  0x33   :  { %918 = vmatpush3.bf16.msra.mxu0 %v915_v22  ;;  %946 = vmatpush3.bf16.msra.mxu1 %v943_v44  ;;  %v333_v34 = vld [vmem:[#allocation5] sm:$0xff]  ;;  %v339_v51 = vld [vmem:[#allocation5 + $0x30] sm:$0xff]  ;;  %v340_v52 = vld [vmem:[#allocation5 + $0x38] sm:$0xff]  ;;  %s1104_s24 = scalar_lea.vmem %s636_s2, 32  ;;  %p1109_p3 = scmp.lt.s32.totalorder %s636_s2, %s636_s2 }
  0x34   :  { %920 = vmatprep.subr.bf16.mxu0 %v919_v29  ;;  %948 = vmatprep.subr.bf16.mxu1 %v947_v49  ;;  %v79_v2 = vsub.s32 1, %v1203_v1  ;;  %v65_v5 = vsub.s32 0, %v1203_v1  ;;  %v95_v8 = vsub.s32 2, %v1203_v1  ;;  %v972_v38 = vpack.c.bf16 %v334_v35, %v333_v34  ;;  %v337_v41 = vld [vmem:[#allocation5 + $0x20] sm:$0xff]  ;;  %v342_v55 = vld [vmem:[#allocation5 + $0x48] sm:$0xff]  ;;  %v344_v58 = vld [vmem:[#allocation5 + $0x58] sm:$0xff]  ;;  %p1105_p2 = scmp.ne.s32.totalorder %s636_s2, %s1104_s24  ;;  %p1110_p4 = scmp.lt.s32.totalorder %s1104_s24, %s1104_s24 }
  0x35   :  { %v978_v43 = vpack.c.bf16 %v338_v42, %v337_v41  ;;  %v346_v61 = vld [vmem:[#allocation5 + $0x68] sm:$0xff]  ;;  %v348_v0 = vld [vmem:[#allocation5 + $0x78] sm:$0xff] }
  0x36   :  { %356 = vperm.xlu1 %1058, %v332_v28   ;;  %v80_v7 = vrot.slane %v51_v6, %v79_v2  ;;  %v66_v9 = vrot.slane %v51_v6, %v65_v5  ;;  %v96_v14 = vrot.slane %v51_v6, %v95_v8  ;;  %v104_v20 = vrot.slane %v1216_v15, %v65_v5  ;;  %v447_v5 = vld [vmem:[#allocation5 + $0x88] sm:$0xff]  ;;  %v448_v6 = vld [vmem:[#allocation5 + $0x90] sm:$0xff]  ;;  %p1111_p5 = por %p1110_p4, %p1109_p3 }
  0x37   :  { %922 = vmatpush3.bf16.msra.mxu0 %v919_v29  ;;  %950 = vmatpush3.bf16.msra.mxu1 %v947_v49  ;;  %v128_v44 = vrot.slane %v1216_v15, %v79_v2 }
  0x38   :  { %924 = vmatprep.subr.bf16.mxu0 %v923_v33  ;;  %952 = vmatprep.subr.bf16.mxu1 %v951_v54  ;;  %p1112_p6 = pnand %p1111_p5, %p1105_p2 }
  0x3a   :  { %351 = vperm.xlu1 %1058, %v325_v32   ;;  %v222_v32 = vld [vmem:[#allocation2 + $0xf8] sm:$0xff] }
  0x3b   :  { %926 = vmatpush3.bf16.msra.mxu0 %v923_v33  ;;  %954 = vmatpush3.bf16.msra.mxu1 %v951_v54  ;;  %v967_v33 = vpack.c.bf16 %v222_v32, %v221_v31  ;;  %v341_v54 = vld [vmem:[#allocation5 + $0x40] sm:$0xff] }
  0x3c   :  { %928 = vmatprep.subr.bf16.mxu0 %v927_v39  ;;  %956 = vmatprep.subr.bf16.mxu1 %v955_v57  ;;  %v984_v56 = vpack.c.bf16 %v342_v55, %v341_v54  ;;  %v540_v54 = vld [vmem:[#allocation5 + $0x110] sm:$0xff] }
  0x3f   :  { %930 = vmatpush3.bf16.msra.mxu0 %v927_v39  ;;  %958 = vmatpush3.bf16.msra.mxu1 %v955_v57  ;;  %v336_v39 = vld [vmem:[#allocation5 + $0x18] sm:$0xff]  ;;  %v343_v57 = vld [vmem:[#allocation5 + $0x50] sm:$0xff] }
  0x40   :  { %932 = vmatprep.subr.bf16.mxu0 %v931_v47  ;;  %960 = vmatprep.subr.bf16.mxu1 %v959_v60  ;;  %v975_v40 = vpack.c.bf16 %v336_v39, %v335_v36  ;;  %v987_v59 = vpack.c.bf16 %v344_v58, %v343_v57  ;;  %v542_v58 = vld [vmem:[#allocation5 + $0x120] sm:$0xff] }
  0x43   :  { %934 = vmatpush3.bf16.msra.mxu0 %v931_v47  ;;  %962 = vmatpush3.bf16.msra.mxu1 %v959_v60  ;;  %v345_v60 = vld [vmem:[#allocation5 + $0x60] sm:$0xff] }
  0x44   :  { %936 = vmatprep.subr.bf16.mxu0 %v935_v53  ;;  %964 = vmatprep.subr.bf16.mxu1 %v963_v63  ;;  %v990_v62 = vpack.c.bf16 %v346_v61, %v345_v60  ;;  %v544_v61 = vld [vmem:[#allocation5 + $0x130] sm:$0xff] }
  0x47   :  { %938 = vmatpush3.bf16.msra.mxu0 %v935_v53  ;;  %966 = vmatpush3.bf16.msra.mxu1 %v963_v63  ;;  %v981_v53 = vpack.c.bf16 %v340_v52, %v339_v51  ;;  %v347_v63 = vld [vmem:[#allocation5 + $0x70] sm:$0xff]  ;;  %v538_v52 = vld [vmem:[#allocation5 + $0x100] sm:$0xff] }
  0x48   :  { %968 = vmatprep.subr.bf16.mxu1 %v967_v33  ;;  %971 = vmatprep.subr.bf16.mxu0 %v1139_v37  ;;  %v993_v2 = vpack.c.bf16 %v348_v0, %v347_v63  ;;  %v546_v0 = vld [vmem:[#allocation5 + $0x140] sm:$0xff] }
  0x4b   :  { %970 = vmatpush3.bf16.msra.mxu1 %v967_v33 }
  0x4c   :  { %995 = vmatprep.subr.bf16.mxu1 %v1139_v37 }
  0xa7   :  { %v61_v3 = vpop.permute.xlu1 %60  ;;  %v56_v4 = vpop.permute.xlu0 %55 }
  0xa8   :  { %v68_v16 = vmul.f32 %v66_v9, %v61_v3  ;;  %v67_v17 = vmul.f32 %v66_v9, %v56_v4  ;;  %v1141_v3 = vmov 0.0   ;;  %v446_v4 = vld [vmem:[#allocation5 + $0x80] sm:$0xff]  ;;  %v449_v9 = vld [vmem:[#allocation5 + $0x98] sm:$0xff] }
  0xac   :  { %v75_v10 = vpop.permute.xlu1 %74  ;;  %v71_v11 = vpop.permute.xlu0 %70 }
  0xad   :  { %v82_v12 = vmul.f32 %v80_v7, %v75_v10  ;;  %v81_v13 = vmul.f32 %v80_v7, %v71_v11  ;;  %v996_v7 = vpack.c.bf16 %v447_v5, %v446_v4  ;;  %v999_v10 = vpack.c.bf16 %v449_v9, %v448_v6  ;;  %v450_v11 = vld [vmem:[#allocation5 + $0xa0] sm:$0xff]  ;;  %v548_v4 = vld [vmem:[#allocation5 + $0x150] sm:$0xff]  ;;  %v549_v5 = vld [vmem:[#allocation5 + $0x158] sm:$0xff] }
  0xae   :  { %v1035_v6 = vpack.c.bf16 %v549_v5, %v548_v4  ;;  %v551_v9 = vld [vmem:[#allocation5 + $0x168] sm:$0xff] }
  0xaf   :  { %v84_v21 = vadd.f32 %v82_v12, %v68_v16  ;;  %v83_v22 = vadd.f32 %v81_v13, %v67_v17  ;;  %v451_v12 = vld [vmem:[#allocation5 + $0xa8] sm:$0xff]  ;;  %v453_v16 = vld [vmem:[#allocation5 + $0xb8] sm:$0xff] }
  0xb0   :  { %v1002_v13 = vpack.c.bf16 %v451_v12, %v450_v11  ;;  %v361_v11 = vsub.s32 3, %v1203_v1 }
  0xb1   :  { %v1218_v18 = vpop.permute.xlu1 %86  ;;  %v1220_v19 = vpop.permute.xlu0 %90 }
  0xb2   :  { %v97_v23 = vmul.f32 %v96_v14, %v1218_v18  ;;  %v98_v24 = vmul.f32 %v96_v14, %v1220_v19  ;;  %v452_v14 = vld [vmem:[#allocation5 + $0xb0] sm:$0xff] }
  0xb3   :  { %v1005_v17 = vpack.c.bf16 %v453_v16, %v452_v14 }
  0xb4   :  { %v100_v25 = vadd.f32 %v98_v24, %v84_v21  ;;  %v99_v26 = vadd.f32 %v97_v23, %v83_v22  ;;  %v455_v21 = vld [vmem:[#allocation5 + $0xc8] sm:$0xff]  ;;  %v456_v23 = vld [vmem:[#allocation5 + $0xd0] sm:$0xff]  ;;  %v457_v24 = vld [vmem:[#allocation5 + $0xd8] sm:$0xff] }
  0xb5   :  { %v357_v12 = vpop.permute.xlu1 %356 }
  0xb6   :  { %v105_v27 = vadd.f32 %v104_v20, %v99_v26  ;;  %v106_v28 = vadd.f32 %v104_v20, %v100_v25  ;;  %v454_v20 = vld [vmem:[#allocation5 + $0xc0] sm:$0xff]  ;;  %v1011_v25 = vpack.c.bf16 %v457_v24, %v456_v23 }
  0xb7   :  { %v1008_v22 = vpack.c.bf16 %v455_v21, %v454_v20  ;;  %v458_v26 = vld [vmem:[#allocation5 + $0xe0] sm:$0xff] }
  0xb8   :  { %v107_v29 = vmax.f32 %v105_v27, 0.0  ;;  %v108_v30 = vmax.f32 %v106_v28, 0.0  ;;  %v459_v27 = vld [vmem:[#allocation5 + $0xe8] sm:$0xff] }
  0xb9   :  { %v1014_v28 = vpack.c.bf16 %v459_v27, %v458_v26  ;;  %v352_v14 = vpop.permute.xlu1 %351  ;;  %v553_v26 = vld [vmem:[#allocation5 + $0x178] sm:$0xff] }
  0xba   :  { %764 = vmatprep.mubr.f32.mxu0 %v107_v29  ;;  %v226_v29 = vrot.slane %v1216_v15, %v95_v8 }
  0xbb   :  { %765 = vmatmul.mubr.f32.vlgmr.msra.gmra.mrb[0].mxu0 %v108_v30 }
  0xbc   :  { %973 = vmatpush3.bf16.msra.mxu0 %v972_v38  ;;  %834 = vmatprep.mubr.msk.f32.mxu0 %vm1140_vm1, %v1141_v3 }
  0xbd   :  { %974 = vmatprep.subr.bf16.mxu0 %v1139_v37 }
  0xc0   :  { %976 = vmatpush3.bf16.msra.mxu0 %v975_v40 }
  0xc1   :  { %977 = vmatprep.subr.bf16.mxu0 %v1139_v37 }
  0xc4   :  { %979 = vmatpush3.bf16.msra.mxu0 %v978_v43 }
  0xc5   :  { %980 = vmatprep.subr.bf16.mxu0 %v1139_v37 }
  0xc8   :  { %982 = vmatpush3.bf16.msra.mxu0 %v981_v53  ;;  %v539_v53 = vld [vmem:[#allocation5 + $0x108] sm:$0xff] }
  0xc9   :  { %983 = vmatprep.subr.bf16.mxu0 %v1139_v37  ;;  %v1020_v55 = vpack.c.bf16 %v539_v53, %v538_v52 }
  0xcc   :  { %985 = vmatpush3.bf16.msra.mxu0 %v984_v56  ;;  %v541_v56 = vld [vmem:[#allocation5 + $0x118] sm:$0xff] }
  0xcd   :  { %986 = vmatprep.subr.bf16.mxu0 %v1139_v37  ;;  %v1023_v57 = vpack.c.bf16 %v541_v56, %v540_v54 }
  0xd0   :  { %988 = vmatpush3.bf16.msra.mxu0 %v987_v59  ;;  %v543_v59 = vld [vmem:[#allocation5 + $0x128] sm:$0xff] }
  0xd1   :  { %989 = vmatprep.subr.bf16.mxu0 %v1139_v37  ;;  %v1026_v60 = vpack.c.bf16 %v543_v59, %v542_v58 }
  0xd4   :  { %991 = vmatpush3.bf16.msra.mxu0 %v990_v62  ;;  %v545_v62 = vld [vmem:[#allocation5 + $0x138] sm:$0xff] }
  0xd5   :  { %992 = vmatprep.subr.bf16.mxu0 %v1139_v37  ;;  %v1029_v63 = vpack.c.bf16 %v545_v62, %v544_v61 }
  0xd8   :  { %994 = vmatpush3.bf16.msra.mxu0 %v993_v2  ;;  %v547_v2 = vld [vmem:[#allocation5 + $0x148] sm:$0xff] }
  0xd9   :  { %1019 = vmatprep.subr.bf16.mxu0 %v1139_v37 }
 0x18e   :  { %v766_v45 = vpop.f32.mrb[0].mxu0 }
 0x18f   :  { %v201_v46 = vadd.f32 %v766_v45, %v128_v44  ;;  %v195_v47 = vpop.f32.mrb[1].mxu0 }
 0x190   :  { %v196_v48 = vadd.f32 %v195_v47, %v128_v44 }
 0x191   :  { %v205_v50 = vmax.f32 %v201_v46, 0.0 }
 0x192   :  { %v204_v49 = vmax.f32 %v196_v48, 0.0 }
 0x194   :  { %799 = vmatprep.mubr.f32.mxu1 %v204_v49 }
 0x195   :  { %800 = vmatmul.mubr.f32.vlgmr.msra.gmra.mrb[0].mxu1 %v205_v50 }
 0x196   :  { %869 = vmatprep.mubr.msk.f32.mxu1 %vm1140_vm1, %v1141_v3  ;;  %997 = vmatpush3.bf16.msra.mxu1 %v996_v7  ;;  %v550_v7 = vld [vmem:[#allocation5 + $0x160] sm:$0xff] }
 0x197   :  { %998 = vmatprep.subr.bf16.mxu1 %v1139_v37 }
 0x19a   :  { %1000 = vmatpush3.bf16.msra.mxu1 %v999_v10  ;;  %v1038_v10 = vpack.c.bf16 %v551_v9, %v550_v7 }
 0x19b   :  { %1001 = vmatprep.subr.bf16.mxu1 %v1139_v37 }
 0x19e   :  { %1003 = vmatpush3.bf16.msra.mxu1 %v1002_v13  ;;  %v362_v13 = vrot.slane %v1216_v15, %v361_v11 }
 0x19f   :  { %1004 = vmatprep.subr.bf16.mxu1 %v1139_v37 }
 0x1a0   :  { %v364_v16 = vmul.f32 %v362_v13, %v357_v12 }
 0x1a2   :  { %1006 = vmatpush3.bf16.msra.mxu1 %v1005_v17  ;;  %v363_v17 = vmul.f32 %v362_v13, %v352_v14  ;;  %v372_v20 = vrot.slane %v364_v16, 7 }
 0x1a3   :  { %1007 = vmatprep.subr.bf16.mxu1 %v1139_v37 }
 0x1a4   :  { %v373_v21 = vsel %vm367_vm2, %v372_v20, %v363_v17 }
 0x1a6   :  { %1009 = vmatpush3.bf16.msra.mxu1 %v1008_v22 }
 0x1a7   :  { %1010 = vmatprep.subr.bf16.mxu1 %v1139_v37 }
 0x1aa   :  { %1012 = vmatpush3.bf16.msra.mxu1 %v1011_v25  ;;  %v552_v25 = vld [vmem:[#allocation5 + $0x170] sm:$0xff] }
 0x1ab   :  { %1013 = vmatprep.subr.bf16.mxu1 %v1139_v37  ;;  %v1041_v27 = vpack.c.bf16 %v553_v26, %v552_v25 }
 0x1ae   :  { %1015 = vmatpush3.bf16.msra.mxu1 %v1014_v28 }
 0x1af   :  { %1016 = vmatprep.subr.bf16.mxu1 %v1139_v37 }
 0x268   :  { %v801_v30 = vpop.f32.mrb[0].mxu1 }
 0x269   :  { %v299_v31 = vadd.f32 %v801_v30, %v226_v29  ;;  %v293_v32 = vpop.f32.mrb[1].mxu1 }
 0x26a   :  { %v294_v33 = vadd.f32 %v293_v32, %v226_v29 }
 0x26b   :  { %v303_v34 = vmax.f32 %v299_v31, 0.0 }
 0x26c   :  { %v302_v35 = vmax.f32 %v294_v33, 0.0  ;;  %v556_v33 = vsub.s32 5, %v1203_v1 }
 0x26d   :  { %v305_v36 = vmul.f32 %v303_v34, %v1220_v19  ;;  %v461_v19 = vld [vmem:[#allocation5 + $0xf8] sm:$0xff] }
 0x26e   :  { %v304_v38 = vmul.f32 %v302_v35, %v1218_v18  ;;  %v460_v18 = vld [vmem:[#allocation5 + $0xf0] sm:$0xff]  ;;  %v557_v34 = vrot.slane %v1216_v15, %v556_v33 }
 0x26f   :  { %v312_v39 = vrot.slane %v305_v36, 4  ;;  %v1017_v51 = vpack.c.bf16 %v461_v19, %v460_v18 }
 0x270   :  { %v306_v40 = vrot.slane %v304_v38, 4 }
 0x271   :  { %v313_v41 = vadd.f32 %v312_v39, %v305_v36  ;;  %1018 = vmatpush3.bf16.msra.mxu1 %v1017_v51 }
 0x272   :  { %v307_v42 = vadd.f32 %v306_v40, %v304_v38 }
 0x273   :  { %v314_v43 = vrot.slane %v313_v41, 2 }
 0x274   :  { %v308_v44 = vrot.slane %v307_v42, 2 }
 0x275   :  { %v315_v45 = vadd.f32 %v314_v43, %v313_v41 }
 0x276   :  { %v309_v46 = vadd.f32 %v308_v44, %v307_v42 }
 0x277   :  { %v316_v47 = vrot.slane %v315_v45, 1 }
 0x278   :  { %v310_v8 = vrot.slane %v309_v46, 1 }
 0x279   :  { %v317_v48 = vadd.f32 %v316_v47, %v315_v45 }
 0x27a   :  { %v311_v49 = vadd.f32 %v310_v8, %v309_v46 }
 0x27c   :  { %v368_v50 = vsel %vm367_vm2, %v317_v48, %v311_v49 }
 0x27d   :  { %835 = vmatmul.mubr.f32.vlgmr.msra.gmra.mrb[2].mxu0 %v368_v50 }
 0x27e   :  { %904 = vmatprep.mubr.msk.f32.mxu0 %vm1140_vm1, %v1141_v3  ;;  %1021 = vmatpush3.bf16.msra.mxu0 %v1020_v55  ;;  %v1032_v3 = vpack.c.bf16 %v547_v2, %v546_v0 }
 0x27f   :  { %1022 = vmatprep.subr.bf16.mxu0 %v1139_v37 }
 0x282   :  { %1024 = vmatpush3.bf16.msra.mxu0 %v1023_v57 }
 0x283   :  { %1025 = vmatprep.subr.bf16.mxu0 %v1139_v37 }
 0x286   :  { %1027 = vmatpush3.bf16.msra.mxu0 %v1026_v60 }
 0x287   :  { %1028 = vmatprep.subr.bf16.mxu0 %v1139_v37 }
 0x28a   :  { %1030 = vmatpush3.bf16.msra.mxu0 %v1029_v63 }
 0x28b   :  { %1031 = vmatprep.subr.bf16.mxu0 %v1139_v37 }
 0x28e   :  { %1033 = vmatpush3.bf16.msra.mxu0 %v1032_v3 }
 0x28f   :  { %1034 = vmatprep.subr.bf16.mxu0 %v1139_v37 }
 0x292   :  { %1036 = vmatpush3.bf16.msra.mxu0 %v1035_v6 }
 0x293   :  { %1037 = vmatprep.subr.bf16.mxu0 %v1139_v37 }
 0x296   :  { %1039 = vmatpush3.bf16.msra.mxu0 %v1038_v10 }
 0x297   :  { %1040 = vmatprep.subr.bf16.mxu0 %v1139_v37  ;;  %v464_v37 = vsub.s32 4, %v1203_v1 }
 0x299   :  { %v465_v28 = vrot.slane %v1216_v15, %v464_v37 }
 0x29a   :  { %1042 = vmatpush3.bf16.msra.mxu0 %v1041_v27 }
 0x350   :  { %v441_v22 = vpop.f32.mrb[2].mxu0 }
 0x351   :  { %v442_v23 = vadd.f32 %v441_v22, %v373_v21  ;;  %v836_v24 = vpop.f32.mrb[3].mxu0 }
 0x353   :  { %870 = vmatmul.mubr.f32.vlgmr.msra.gmra.mrb[2].mxu1 %v442_v23 }
 0x426   :  { %v532_v29 = vpop.f32.mrb[2].mxu1 }
 0x427   :  { %v533_v30 = vadd.f32 %v532_v29, %v465_v28  ;;  %v871_v31 = vpop.f32.mrb[3].mxu1 }
 0x429   :  { %v536_v32 = vmax.f32 %v533_v30, 0.0 }
 0x42b   :  { %905 = vmatmul.mubr.f32.vlgmr.msra.gmra.mrb[4].mxu0 %v536_v32 }
 0x4fe   :  { %v624_v35 = vpop.f32.mrb[4].mxu0 }
 0x4ff   :  { %v625_v36 = vadd.f32 %v624_v35, %v557_v34  ;;  %v906_v38 = vpop.f32.mrb[5].mxu0 }
 0x501   :  { %628 = vst [vmem:[#allocation7] sm:$0x3] %v625_v36 }
 0x502   :  { %1115 = shalt.err (!%p1112_p6)
}
 0x503   :  { %s1116_s27 = scalar_lea.hbm %s1286_s5, 32 }
 0x504   :  { %p1117_p7 = scmp.ne.s32.totalorder %s1286_s5, %s1116_s27  ;;  %p1120_p8 = scmp.lt.u32.totalorder %s1116_s27, %s1286_s5 }
 0x506   :  { %p1122_p9 = pnand %p1120_p8, %p1117_p7 }
 0x508   :  { %1125 = shalt.err (!%p1122_p9)
}
 0x509   :  { %638 = dma.vmem_to_hbm [thread:$0]  %s636_s2, 32, %s1286_s5, [#allocation4]  }
 0x50a   :  { %1130 = dma.done.wait [#allocation4], 32  }
 0x50b   :  { %1131 = vsyncadd [#allocation4], 4294967264 }
 0x50c   :  { %642 = vsyncpa [#allocation3], 1 }
 0x50d   :  { %643 = vsyncpa [#allocation6], 1 }
 0x50e   :  { %644 = vsyncpa [#allocation4], 1 }

</bundles_post_ra>
